<compile_context>
chip_gen: v5e
topology: v5e:2x2
jax: 0.10.0
libtpu: 0.0.40
codegen_flags: <defaults>
</compile_context>

<pallas_src>
import math
from functools import partial

import jax
import jax.numpy as jnp
from jax.experimental import pallas as pl
from jax.experimental.pallas import tpu as pltpu


# ----------------------------------------------------------------------------
# Kernel
# ----------------------------------------------------------------------------
def policy_kernel(x_ref, w1_ref, w23_ref, bias_ref, out_ref):
    H = w1_ref.shape[0]
    n_out = w23_ref.shape[0]

    x = x_ref[...]                             # (tb, in)   batch-major input tile
    w1 = w1_ref[...]                           # (H, in)    PyTorch layout
    w23 = w23_ref[...]                         # (out, H)   fused layer2+layer3
    b1 = bias_ref[0:H, :]                      # (H, 1)
    b23 = bias_ref[H:H + n_out, :]             # (out, 1)

    # layer1: h1^T[H, tb] = w1 @ x^T  (trans_b matmul pattern, batch -> lanes)
    h1_t = jax.lax.dot_general(
        w1, x, dimension_numbers=(((1,), (1,)), ((), ())),
        preferred_element_type=jnp.float32) + b1
    h1_t = jnp.maximum(h1_t, 0.0)              # relu (lane-dense)

    # fused layer2 (NoisyLinear, no activation) + layer3: single matmul
    logits_t = jnp.dot(w23, h1_t, preferred_element_type=jnp.float32) + b23  # (out, tb)

    # softmax over the action axis (sublane axis); batch stays lane-dense
    m = jnp.max(logits_t, axis=0, keepdims=True)
    e = jnp.exp(logits_t - m)
    s = jnp.sum(e, axis=0, keepdims=True)
    probs_t = e / s                            # exact divide: probs sum to 1

    # Categorical(logits=probs) epilogue: normalized log-probs
    #   = probs - logsumexp(probs).  probs in [0, 1] -> no max-subtraction.
    lse = jnp.log(jnp.sum(jnp.exp(probs_t), axis=0, keepdims=True))
    cat_logits_t = probs_t - lse

    # single lane-dense output slab: rows [0:out] = probs, [out:2*out] = log-probs
    out_ref[...] = jnp.concatenate([probs_t, cat_logits_t], axis=0)


# ----------------------------------------------------------------------------
# One-time parameter preprocessing (when params are created / updated,
# NOT per forward call).
# ----------------------------------------------------------------------------
def prepare_policy_params(params):
    """Pre-combine the noisy layer's effective weights, fuse layer2 into layer3
    (exact: no activation between them), and pack both biases into one block."""
    w2_eff = params["w2_mu"] + params["w2_sigma"] * (params["w2_mu"] + params["w2_sigma"])
    b2_eff = params["b2_mu"] + params["b2_sigma"] * (params["b2_mu"] + params["b2_sigma"])
    #   logits = (h1 @ w2_eff^T + b2_eff) @ w3^T + b3
    #          =  h1 @ (w3 @ w2_eff)^T + (w3 @ b2_eff + b3)
    w23 = params["w3"] @ w2_eff                          # (out, H)
    b23 = params["w3"] @ b2_eff + params["b3"]           # (out,)
    bias = jnp.concatenate([params["b1"], b23]).reshape(-1, 1)   # (H+out, 1)
    return {"w1": params["w1"], "w23": w23, "bias": bias}


def _round_up(x, m):
    return ((x + m - 1) // m) * m


# ----------------------------------------------------------------------------
# Forward wrapper
# ----------------------------------------------------------------------------
@partial(jax.jit, static_argnames=("block_batch",))
def categorical_policy_forward(x, prep, *, block_batch=2048):
    """Returns (probs, cat_logits) in lane-dense (out, B) layout (batch on the
    last axis). Values are identical to the module's softmax probabilities and
    Categorical(logits=probs).logits."""
    B, in_size = x.shape
    H = prep["w1"].shape[0]
    n_out = prep["w23"].shape[0]

    # --- batch tile selection (batch lives on the lane axis of the output) ---
    bp = _round_up(B, 128)                    # lane tiles are 128 wide
    if bp <= 256:
        tb = bp                               # tiny batch: one grid step (v5e/v6e)
    else:
        # >=2 grid steps so the "parallel" axis can span both TCs on v7x,
        # capped so VMEM stays bounded for very large batches.
        tb = min(block_batch, _round_up(bp // 2, 128))
    grid_n = pl.cdiv(bp, tb)
    Bp = grid_n * tb

    xp = x if Bp == B else jnp.pad(x, ((0, Bp - B), (0, 0)))

    weight_spec = lambda shape: pl.BlockSpec(shape, lambda i: (0, 0))

    cost = pl.CostEstimate(
        flops=2 * B * (in_size * H + H * n_out),
        transcendentals=B * (2 * n_out + 2),
        bytes_accessed=4 * (B * (in_size + 2 * n_out)
                            + H * in_size + n_out * H + H + n_out),
    )

    out = pl.pallas_call(
        policy_kernel,
        out_shape=jax.ShapeDtypeStruct((2 * n_out, Bp), jnp.float32),
        grid=(grid_n,),
        in_specs=[
            pl.BlockSpec((tb, in_size), lambda i: (i, 0)),   # x (batch rows)
            weight_spec((H, in_size)),                       # w1 (PyTorch layout)
            weight_spec((n_out, H)),                         # w23 (fused layer2+3)
            weight_spec((H + n_out, 1)),                     # [b1; b23] column
        ],
        out_specs=pl.BlockSpec((2 * n_out, tb), lambda i: (0, i)),
        compiler_params=pltpu.CompilerParams(
            dimension_semantics=("parallel",)),              # batch axis -> both TCs on v7x
        cost_estimate=cost,
    )(xp, prep["w1"], prep["w23"], prep["bias"])

    probs_t = out[:n_out, :B]          # (out, B)
    cat_logits_t = out[n_out:, :B]     # (out, B)

    # TODO(synk): torch.distributions.Categorical sampling / entropy methods have
    # no Pallas equivalent; callers get probs and the distribution's normalized
    # log-probs (its canonical parameters) instead.
    return probs_t, cat_logits_t


# ----------------------------------------------------------------------------
# Init mirroring the PyTorch module's __init__
# ----------------------------------------------------------------------------
def init_params(key, input_size, hidden, output_size, std_init=0.4):
    k1, k2, k3, k4 = jax.random.split(key, 4)

    def xavier_uniform(k, out_f, in_f):
        bound = math.sqrt(6.0 / (in_f + out_f))
        return jax.random.uniform(k, (out_f, in_f), jnp.float32, -bound, bound)

    mu_range = 1.0 / math.sqrt(hidden)
    return {
        # layer1: nn.Linear(input, hidden), xavier_uniform weight, zero bias
        "w1": xavier_uniform(k1, hidden, input_size),
        "b1": jnp.zeros((hidden,), jnp.float32),
        # layer2: NoisyLinear(hidden, hidden)
        "w2_mu": jax.random.uniform(k2, (hidden, hidden), jnp.float32, -mu_range, mu_range),
        "w2_sigma": jnp.full((hidden, hidden), std_init / math.sqrt(hidden), jnp.float32),
        "b2_mu": jax.random.uniform(k3, (hidden,), jnp.float32, -mu_range, mu_range),
        "b2_sigma": jnp.full((hidden,), std_init / math.sqrt(hidden), jnp.float32),
        # layer3: nn.Linear(hidden, output), xavier_uniform weight, zero bias
        "w3": xavier_uniform(k4, output_size, hidden),
        "b3": jnp.zeros((output_size,), jnp.float32),
    }


def reference_forward(x, p):
    """Plain-JAX reference of the PyTorch forward (training mode)."""
    h1 = jax.nn.relu(x @ p["w1"].T + p["b1"])
    w_eff = p["w2_mu"] + p["w2_sigma"] * (p["w2_mu"] + p["w2_sigma"])
    b_eff = p["b2_mu"] + p["b2_sigma"] * (p["b2_mu"] + p["b2_sigma"])
    h2 = h1 @ w_eff.T + b_eff
    logits = h2 @ p["w3"].T + p["b3"]
    probs = jax.nn.softmax(logits, axis=1)
    cat_logits = probs - jax.nn.logsumexp(probs, axis=1, keepdims=True)
    return probs, cat_logits


if __name__ == "__main__":
    key = jax.random.PRNGKey(0)
    k_x, k_p = jax.random.split(key)

    batch = 200            # deliberately not a multiple of 128: exercises the padded tail
    input_size = 16
    hidden = 32
    output_size = 8

    x = jax.random.normal(k_x, (batch, input_size), jnp.float32)
    params = init_params(k_p, input_size, hidden, output_size)
    prep = prepare_policy_params(params)     # one-time: fuse / combine / pack

    probs_t, cat_logits_t = categorical_policy_forward(x, prep)
    probs_t = jax.block_until_ready(probs_t)
    cat_logits_t = jax.block_until_ready(cat_logits_t)

    ref_probs, ref_cat_logits = reference_forward(x, params)

    assert probs_t.shape == (output_size, batch)
    assert cat_logits_t.shape == (output_size, batch)
    # kernel emits (out, B) lane-dense layout; compare against reference transposed
    assert jnp.allclose(probs_t.T, ref_probs, atol=1e-4, rtol=1e-4), "probs mismatch"
    assert jnp.allclose(cat_logits_t.T, ref_cat_logits, atol=1e-4, rtol=1e-4), "log-prob mismatch"
    assert jnp.allclose(jnp.sum(probs_t, axis=0), 1.0, atol=1e-4)

    print("KERNEL_OK")
</pallas_src>

<mosaic_0001>
module attributes {stable_mosaic.version = 11 : i64} {
  func.func @policy_kernel(%arg0: i32, %arg1: memref<256x16xf32, #tpu.memory_space<vmem>>, %arg2: memref<32x16xf32, #tpu.memory_space<vmem>>, %arg3: memref<8x32xf32, #tpu.memory_space<vmem>>, %arg4: memref<40x1xf32, #tpu.memory_space<vmem>>, %arg5: memref<16x256xf32, #tpu.memory_space<vmem>>) attributes {dimension_semantics = [#tpu.dimension_semantics<parallel>], iteration_bounds = array<i64: 1>, scalar_prefetch = 0 : i64, scratch_operands = 0 : i64, tpu.core_type = #tpu.core_type<tc>, window_params = [{transform_indices = @transform_0, window_bounds = array<i64: 256, 16>}, {pipeline_mode = #tpu.pipeline_mode<synchronous>, transform_indices = @transform_1, window_bounds = array<i64: 32, 16>}, {pipeline_mode = #tpu.pipeline_mode<synchronous>, transform_indices = @transform_2, window_bounds = array<i64: 8, 32>}, {pipeline_mode = #tpu.pipeline_mode<synchronous>, transform_indices = @transform_3, window_bounds = array<i64: 40, 1>}, {transform_indices = @transform_4, window_bounds = array<i64: 16, 256>}]} {
    %c0 = arith.constant 0 : index
    %c0_0 = arith.constant 0 : index
    %0 = vector.load %arg1[%c0, %c0_0] : memref<256x16xf32, #tpu.memory_space<vmem>>, vector<256x16xf32>
    %c0_1 = arith.constant 0 : index
    %c0_2 = arith.constant 0 : index
    %1 = vector.load %arg2[%c0_1, %c0_2] : memref<32x16xf32, #tpu.memory_space<vmem>>, vector<32x16xf32>
    %c0_3 = arith.constant 0 : index
    %c0_4 = arith.constant 0 : index
    %2 = vector.load %arg3[%c0_3, %c0_4] : memref<8x32xf32, #tpu.memory_space<vmem>>, vector<8x32xf32>
    %c0_5 = arith.constant 0 : index
    %c0_6 = arith.constant 0 : index
    %3 = vector.load %arg4[%c0_5, %c0_6] : memref<40x1xf32, #tpu.memory_space<vmem>>, vector<32x1xf32>
    %c32 = arith.constant 32 : index
    %c0_7 = arith.constant 0 : index
    %4 = vector.load %arg4[%c32, %c0_7] : memref<40x1xf32, #tpu.memory_space<vmem>>, vector<8x1xf32>
    %cst = arith.constant dense<0.000000e+00> : vector<32x256xf32>
    %5 = tpu.matmul %1, %0, %cst {dimension_numbers = #tpu.dot_dimension_numbers<[1], [1], [0], [0], [0, 0, 1, 0], [], []>} : vector<32x16xf32>, vector<256x16xf32>, vector<32x256xf32> -> vector<32x256xf32>
    %6 = vector.broadcast %3 : vector<32x1xf32> to vector<32x256xf32>
    %7 = arith.addf %5, %6 : vector<32x256xf32>
    %cst_8 = arith.constant 0.000000e+00 : f32
    %8 = vector.broadcast %cst_8 : f32 to vector<32x256xf32>
    %9 = arith.maximumf %7, %8 : vector<32x256xf32>
    %cst_9 = arith.constant dense<0.000000e+00> : vector<8x256xf32>
    %10 = tpu.matmul %2, %9, %cst_9 {dimension_numbers = #tpu.dot_dimension_numbers<[1], [0], [0], [1], [0, 0, 1, 1], [], []>} : vector<8x32xf32>, vector<32x256xf32>, vector<8x256xf32> -> vector<8x256xf32>
    %11 = vector.broadcast %4 : vector<8x1xf32> to vector<8x256xf32>
    %12 = arith.addf %10, %11 : vector<8x256xf32>
    %cst_10 = arith.constant dense<0xFF800000> : vector<256xf32>
    %13 = vector.multi_reduction <maximumf>, %12, %cst_10 [0] : vector<8x256xf32> to vector<256xf32>
    %14 = vector.shape_cast %13 : vector<256xf32> to vector<1x256xf32>
    %15 = vector.broadcast %14 : vector<1x256xf32> to vector<8x256xf32>
    %16 = arith.subf %12, %15 : vector<8x256xf32>
    %17 = math.exp %16 : vector<8x256xf32>
    %cst_11 = arith.constant dense<0.000000e+00> : vector<256xf32>
    %18 = vector.multi_reduction <add>, %17, %cst_11 [0] : vector<8x256xf32> to vector<256xf32>
    %19 = vector.shape_cast %18 : vector<256xf32> to vector<1x256xf32>
    %20 = vector.broadcast %19 : vector<1x256xf32> to vector<8x256xf32>
    %21 = arith.divf %17, %20 : vector<8x256xf32>
    %22 = math.exp %21 : vector<8x256xf32>
    %cst_12 = arith.constant dense<0.000000e+00> : vector<256xf32>
    %23 = vector.multi_reduction <add>, %22, %cst_12 [0] : vector<8x256xf32> to vector<256xf32>
    %24 = vector.shape_cast %23 : vector<256xf32> to vector<1x256xf32>
    %25 = math.log %24 : vector<1x256xf32>
    %26 = vector.broadcast %25 : vector<1x256xf32> to vector<8x256xf32>
    %27 = arith.subf %21, %26 : vector<8x256xf32>
    %28 = tpu.concatenate %21, %27 in 0 : vector<8x256xf32>, vector<8x256xf32> -> vector<16x256xf32>
    %c0_13 = arith.constant 0 : index
    %c0_14 = arith.constant 0 : index
    %29 = vector.load %arg5[%c0_13, %c0_14] : memref<16x256xf32, #tpu.memory_space<vmem>>, vector<16x256xf32>
    tpu.vector_store %arg5[%c0_13, %c0_14], %28 {strides = array<i32>} : memref<16x256xf32, #tpu.memory_space<vmem>>, vector<16x256xf32>,
    return
  }
  func.func @transform_0(%arg0: i32) -> (i32, i32) {
    %c0_i32 = arith.constant 0 : i32
    %c0_i32_0 = arith.constant 0 : i32
    return %arg0, %c0_i32 : i32, i32
  }
  func.func @transform_1(%arg0: i32) -> (i32, i32) {
    %c0_i32 = arith.constant 0 : i32
    %c0_i32_0 = arith.constant 0 : i32
    %c0_i32_1 = arith.constant 0 : i32
    return %c0_i32, %c0_i32_0 : i32, i32
  }
  func.func @transform_2(%arg0: i32) -> (i32, i32) {
    %c0_i32 = arith.constant 0 : i32
    %c0_i32_0 = arith.constant 0 : i32
    %c0_i32_1 = arith.constant 0 : i32
    return %c0_i32, %c0_i32_0 : i32, i32
  }
  func.func @transform_3(%arg0: i32) -> (i32, i32) {
    %c0_i32 = arith.constant 0 : i32
    %c0_i32_0 = arith.constant 0 : i32
    %c0_i32_1 = arith.constant 0 : i32
    return %c0_i32, %c0_i32_0 : i32, i32
  }
  func.func @transform_4(%arg0: i32) -> (i32, i32) {
    %c0_i32 = arith.constant 0 : i32
    %c0_i32_0 = arith.constant 0 : i32
    return %c0_i32, %arg0 : i32, i32
  }
}

</mosaic_0001>

<bundles_post_ra>
// kernel: categorical_policy_forward.1
= control target key start
LH: loop header
LB: loop body
LE: loop exit
PB: predicated region body
PF: predicated region fallthrough
CT: control target
= control target key end

     0   :  { %vm79_vm0 = vcmask 130048   ;;  %v455_v21 = vmov 0   ;;  %vm259_vm1 = vcmask 261120   ;;  %s659_s0 = inlined_call_operand.vmem [shape: f32[256,16], index: 0, kind: input, shape index: {}]   ;;  %s660_s3 = inlined_call_operand.vmem [shape: f32[40,1], index: 3, kind: input, shape index: {}]   ;;  %s661_s1 = inlined_call_operand.vmem [shape: f32[32,16], index: 1, kind: input, shape index: {}]   ;;  %s662_s2 = inlined_call_operand.vmem [shape: f32[8,32], index: 2, kind: input, shape index: {}]   ;;  %s663_s4 = inlined_call_operand.vmem [shape: f32[16,256], index: 4, kind: output, shape index: {}]  }
   0x1   :  { %v32_v0 = vld [vmem:[%s659_s0 + $0x78] sm:$0xff]  ;;  %v31_v2 = vld [vmem:[%s659_s0 + $0x70] sm:$0xff]  ;;  %v30_v4 = vld [vmem:[%s659_s0 + $0x68] sm:$0xff]  ;;  %437 = vset.pattern.permute.xlu1 %v455_v21  ;;  %436 = vset.pattern.permute.xlu0 %v455_v21 }
   0x2   :  { %v48_v1 = vld [vmem:[%s659_s0 + $0xf8] sm:$0xff]  ;;  %393 = vmatpush.xpose.msk.msra.mxu0 %vm79_vm0, %v32_v0  ;;  %v47_v3 = vld [vmem:[%s659_s0 + $0xf0] sm:$0xff]  ;;  %v46_v5 = vld [vmem:[%s659_s0 + $0xe8] sm:$0xff]  ;;  %438 = vset.pattern.permute.xlu2 %v455_v21 }
   0x3   :  { %413 = vmatpush.xpose.msk.msra.mxu1 %vm79_vm0, %v48_v1  ;;  %v29_v6 = vld [vmem:[%s659_s0 + $0x60] sm:$0xff]  ;;  %v28_v8 = vld [vmem:[%s659_s0 + $0x58] sm:$0xff]  ;;  %v27_v10 = vld [vmem:[%s659_s0 + $0x50] sm:$0xff] }
   0x4   :  { %v45_v7 = vld [vmem:[%s659_s0 + $0xe0] sm:$0xff]  ;;  %v44_v9 = vld [vmem:[%s659_s0 + $0xd8] sm:$0xff]  ;;  %v43_v11 = vld [vmem:[%s659_s0 + $0xd0] sm:$0xff] }
   0x5   :  { %v26_v12 = vld [vmem:[%s659_s0 + $0x48] sm:$0xff]  ;;  %v25_v14 = vld [vmem:[%s659_s0 + $0x40] sm:$0xff]  ;;  %v24_v16 = vld [vmem:[%s659_s0 + $0x38] sm:$0xff] }
   0x6   :  { %394 = vmatpush.xpose.msk.msra.mxu0 %vm79_vm0, %v31_v2  ;;  %v42_v13 = vld [vmem:[%s659_s0 + $0xc8] sm:$0xff]  ;;  %v41_v15 = vld [vmem:[%s659_s0 + $0xc0] sm:$0xff]  ;;  %v40_v17 = vld [vmem:[%s659_s0 + $0xb8] sm:$0xff] }
   0x7   :  { %414 = vmatpush.xpose.msk.msra.mxu1 %vm79_vm0, %v47_v3  ;;  %v55_v18 = vld [vmem:[%s660_s3 + $0x8] sm:$0xff]  ;;  %v23_v19 = vld [vmem:[%s659_s0 + $0x30] sm:$0xff]  ;;  %v54_v24 = vld [vmem:[%s660_s3] sm:$0xff] }
   0x8   :  { %v39_v20 = vld [vmem:[%s659_s0 + $0xb0] sm:$0xff]  ;;  %66 = vperm.xlu1 %437, %v55_v18   ;;  %v22_v22 = vld [vmem:[%s659_s0 + $0x28] sm:$0xff]  ;;  %v21_v25 = vld [vmem:[%s659_s0 + $0x20] sm:$0xff] }
   0x9   :  { %v38_v23 = vld [vmem:[%s659_s0 + $0xa8] sm:$0xff]  ;;  %v37_v26 = vld [vmem:[%s659_s0 + $0xa0] sm:$0xff]  ;;  %v20_v27 = vld [vmem:[%s659_s0 + $0x18] sm:$0xff] }
   0xa   :  { %395 = vmatpush.xpose.msk.msra.mxu0 %vm79_vm0, %v30_v4  ;;  %v36_v28 = vld [vmem:[%s659_s0 + $0x98] sm:$0xff]  ;;  %v19_v30 = vld [vmem:[%s659_s0 + $0x10] sm:$0xff]  ;;  %v18_v32 = vld [vmem:[%s659_s0 + $0x8] sm:$0xff] }
   0xb   :  { %415 = vmatpush.xpose.msk.msra.mxu1 %vm79_vm0, %v46_v5  ;;  %v57_v29 = vld [vmem:[%s660_s3 + $0x18] sm:$0xff]  ;;  %v35_v31 = vld [vmem:[%s659_s0 + $0x90] sm:$0xff]  ;;  %v34_v33 = vld [vmem:[%s659_s0 + $0x88] sm:$0xff] }
   0xc   :  { %76 = vperm.xlu0 %436, %v57_v29   ;;  %v56_v34 = vld [vmem:[%s660_s3 + $0x10] sm:$0xff]  ;;  %v17_v35 = vld [vmem:[%s659_s0] sm:$0xff]  ;;  %v50_v38 = vld [vmem:[%s661_s1 + $0x8] sm:$0xff] }
   0xd   :  { %v33_v36 = vld [vmem:[%s659_s0 + $0x80] sm:$0xff]  ;;  %v51_v39 = vld [vmem:[%s661_s1 + $0x10] sm:$0xff]  ;;  %v52_v40 = vld [vmem:[%s661_s1 + $0x18] sm:$0xff] }
   0xe   :  { %396 = vmatpush.xpose.msk.msra.mxu0 %vm79_vm0, %v29_v6  ;;  %v49_v37 = vld [vmem:[%s661_s1] sm:$0xff] }
   0xf   :  { %416 = vmatpush.xpose.msk.msra.mxu1 %vm79_vm0, %v45_v7  ;;  %v58_v43 = vld [vmem:[%s660_s3 + $0x20] sm:$0xff] }
  0x10   :  { %61 = vperm.xlu1 %437, %v54_v24   ;;  %256 = vperm.xlu2 %438, %v58_v43   ;;  %v53_v6 = vld [vmem:[%s662_s2] sm:$0xff] }
  0x12   :  { %397 = vmatpush.xpose.msk.msra.mxu0 %vm79_vm0, %v28_v8 }
  0x13   :  { %417 = vmatpush.xpose.msk.msra.mxu1 %vm79_vm0, %v44_v9 }
  0x14   :  { %71 = vperm.xlu0 %436, %v56_v34  }
  0x16   :  { %398 = vmatpush.xpose.msk.msra.mxu0 %vm79_vm0, %v27_v10 }
  0x17   :  { %418 = vmatpush.xpose.msk.msra.mxu1 %vm79_vm0, %v43_v11 }
  0x1a   :  { %399 = vmatpush.xpose.msk.msra.mxu0 %vm79_vm0, %v26_v12 }
  0x1b   :  { %419 = vmatpush.xpose.msk.msra.mxu1 %vm79_vm0, %v42_v13 }
  0x1e   :  { %400 = vmatpush.xpose.msk.msra.mxu0 %vm79_vm0, %v25_v14 }
  0x1f   :  { %420 = vmatpush.xpose.msk.msra.mxu1 %vm79_vm0, %v41_v15 }
  0x22   :  { %401 = vmatpush.xpose.msk.msra.mxu0 %vm79_vm0, %v24_v16 }
  0x23   :  { %421 = vmatpush.xpose.msk.msra.mxu1 %vm79_vm0, %v40_v17 }
  0x26   :  { %402 = vmatpush.xpose.msk.msra.mxu0 %vm79_vm0, %v23_v19 }
  0x27   :  { %422 = vmatpush.xpose.msk.msra.mxu1 %vm79_vm0, %v39_v20 }
  0x2a   :  { %403 = vmatpush.xpose.msk.msra.mxu0 %vm79_vm0, %v22_v22 }
  0x2b   :  { %423 = vmatpush.xpose.msk.msra.mxu1 %vm79_vm0, %v38_v23 }
  0x2e   :  { %404 = vmatpush.xpose.msk.msra.mxu0 %vm79_vm0, %v21_v25 }
  0x2f   :  { %424 = vmatpush.xpose.msk.msra.mxu1 %vm79_vm0, %v37_v26 }
  0x32   :  { %405 = vmatpush.xpose.msk.msra.mxu0 %vm79_vm0, %v20_v27 }
  0x33   :  { %425 = vmatpush.xpose.msk.msra.mxu1 %vm79_vm0, %v36_v28 }
  0x36   :  { %406 = vmatpush.xpose.msk.msra.mxu0 %vm79_vm0, %v19_v30 }
  0x37   :  { %426 = vmatpush.xpose.msk.msra.mxu1 %vm79_vm0, %v35_v31 }
  0x3a   :  { %407 = vmatpush.xpose.msk.msra.mxu0 %vm79_vm0, %v18_v32 }
  0x3b   :  { %427 = vmatpush.xpose.msk.msra.mxu1 %vm79_vm0, %v34_v33 }
  0x3e   :  { %408 = vmatpush.xpose.msk.msra.mxu0 %vm79_vm0, %v17_v35 }
  0x3f   :  { %428 = vmatpush.xpose.msk.msra.mxu1 %vm79_vm0, %v33_v36 }
  0x41   :  { %409 = vmatmul.msk.f32.vlgmr.msra.gmra.mxu0 %vm79_vm0, %v49_v37 }
  0x42   :  { %429 = vmatmul.msk.f32.vlgmr.msra.gmra.mxu1 %vm79_vm0, %v49_v37 }
  0x49   :  { %410 = vmatmul.msk.f32.gmra.mxu0 %vm79_vm0, %v50_v38 }
  0x4a   :  { %430 = vmatmul.msk.f32.gmra.mxu1 %vm79_vm0, %v50_v38 }
  0x51   :  { %411 = vmatmul.msk.f32.gmra.mxu0 %vm79_vm0, %v51_v39 }
  0x52   :  { %431 = vmatmul.msk.f32.gmra.mxu1 %vm79_vm0, %v51_v39 }
  0x59   :  { %412 = vmatmul.msk.f32.gmra.mxu0 %vm79_vm0, %v52_v40 }
  0x5a   :  { %432 = vmatmul.msk.f32.gmra.mxu1 %vm79_vm0, %v52_v40 }
  0x6a   :  { %v257_v7 = vpop.permute.xlu2 %256 }
  0x7a   :  { %v67_v47 = vpop.permute.xlu1 %66 }
  0x7e   :  { %v77_v46 = vpop.permute.xlu0 %76 }
  0x82   :  { %v62_v57 = vpop.permute.xlu1 %61 }
  0x86   :  { %v72_v50 = vpop.permute.xlu0 %71 }
  0xbe   :  { %v205_v41 = vpop.f32.mrf.mxu0 }
  0xbf   :  { %v234_v42 = vpop.f32.mrf.mxu1  ;;  %v206_v62 = vadd.f32 %v205_v41, %v62_v57 }
  0xc0   :  { %v235_v63 = vadd.f32 %v234_v42, %v62_v57 }
  0xc1   :  { %v246_v4 = vmax.f32 %v206_v62, 0.0 }
  0xc2   :  { %v247_v5 = vmax.f32 %v235_v63, 0.0 }
  0xc6   :  { %v208_v44 = vpop.f32.mrf.mxu0 }
  0xc7   :  { %v237_v45 = vpop.f32.mrf.mxu1  ;;  %v209_v58 = vadd.f32 %v208_v44, %v67_v47 }
  0xc8   :  { %v238_v59 = vadd.f32 %v237_v45, %v67_v47 }
  0xc9   :  { %v248_v2 = vmax.f32 %v209_v58, 0.0 }
  0xca   :  { %v249_v3 = vmax.f32 %v238_v59, 0.0 }
  0xce   :  { %v211_v48 = vpop.f32.mrf.mxu0 }
  0xcf   :  { %v240_v49 = vpop.f32.mrf.mxu1  ;;  %v212_v53 = vadd.f32 %v211_v48, %v72_v50 }
  0xd0   :  { %v241_v54 = vadd.f32 %v240_v49, %v72_v50 }
  0xd1   :  { %v250_v0 = vmax.f32 %v212_v53, 0.0 }
  0xd2   :  { %v251_v1 = vmax.f32 %v241_v54, 0.0 }
  0xd6   :  { %v214_v51 = vpop.f32.mrf.mxu0 }
  0xd7   :  { %v243_v52 = vpop.f32.mrf.mxu1  ;;  %v215_v55 = vadd.f32 %v214_v51, %v77_v46 }
  0xd8   :  { %v244_v56 = vadd.f32 %v243_v52, %v77_v46 }
  0xd9   :  { %v252_v60 = vmax.f32 %v215_v55, 0.0 }
  0xda   :  { %v253_v61 = vmax.f32 %v244_v56, 0.0 }
  0xdb   :  { %275 = vmatpush.msra.mxu2 %v252_v60 }
  0xdc   :  { %295 = vmatpush.msra.mxu3 %v253_v61 }
  0xdd   :  { %276 = vmatpush.msra.mxu2 %v250_v0 }
  0xde   :  { %296 = vmatpush.msra.mxu3 %v251_v1 }
  0xdf   :  { %277 = vmatpush.msra.mxu2 %v248_v2 }
  0xe0   :  { %297 = vmatpush.msra.mxu3 %v249_v3 }
  0xe1   :  { %278 = vmatpush.msra.mxu2 %v246_v4 }
  0xe2   :  { %298 = vmatpush.msra.mxu3 %v247_v5  ;;  %433 = vmatmul.msk.f32.vlgmr.msra.gmra.mxu2 %vm259_vm1, %v53_v6 }
  0xe3   :  { %434 = vmatmul.msk.f32.vlgmr.msra.gmra.mxu3 %vm259_vm1, %v53_v6 }
 0x165   :  { %v280_v8 = vpop.f32.mrf.mxu2 }
 0x166   :  { %v300_v9 = vpop.f32.mrf.mxu3  ;;  %v281_v10 = vadd.f32 %v280_v8, %v257_v7 }
 0x167   :  { %v301_v11 = vadd.f32 %v300_v9, %v257_v7 }
 0x168   :  { %v303_v12 = vrot.slane %v281_v10, 4 }
 0x169   :  { %v309_v13 = vrot.slane %v301_v11, 4 }
 0x16a   :  { %v304_v14 = vmax.f32 %v281_v10, %v303_v12 }
 0x16b   :  { %v310_v15 = vmax.f32 %v301_v11, %v309_v13 }
 0x16c   :  { %v305_v16 = vrot.slane %v304_v14, 2 }
 0x16d   :  { %v311_v17 = vrot.slane %v310_v15, 2 }
 0x16e   :  { %v306_v18 = vmax.f32 %v304_v14, %v305_v16 }
 0x16f   :  { %v312_v19 = vmax.f32 %v310_v15, %v311_v17 }
 0x170   :  { %v307_v20 = vrot.slane %v306_v18, 1 }
 0x171   :  { %v313_v21 = vrot.slane %v312_v19, 1 }
 0x172   :  { %v308_v22 = vmax.f32 %v306_v18, %v307_v20 }
 0x173   :  { %v314_v23 = vmax.f32 %v312_v19, %v313_v21 }
 0x174   :  { %v315_v24 = vsub.f32 %v281_v10, %v308_v22 }
 0x175   :  { %v316_v25 = vsub.f32 %v301_v11, %v314_v23 }
 0x176   :  { %v317_v26 = vmul.f32 1.442695, %v315_v24 }
 0x177   :  { %v319_v27 = vmul.f32 1.442695, %v316_v25 }
 0x178   :  { %439 = vpow2.f32 %v317_v26 }
 0x179   :  { %441 = vpow2.f32 %v319_v27 }
 0x17e   :  { %v440_v28 = vpop.eup %439 }
 0x17f   :  { %v442_v29 = vpop.eup %441  ;;  %v321_v30 = vrot.slane %v440_v28, 4 }
 0x180   :  { %v327_v31 = vrot.slane %v442_v29, 4 }
 0x181   :  { %v322_v32 = vadd.f32 %v440_v28, %v321_v30 }
 0x182   :  { %v328_v33 = vadd.f32 %v442_v29, %v327_v31 }
 0x183   :  { %v323_v34 = vrot.slane %v322_v32, 2 }
 0x184   :  { %v329_v35 = vrot.slane %v328_v33, 2 }
 0x185   :  { %v324_v36 = vadd.f32 %v323_v34, %v322_v32 }
 0x186   :  { %v330_v37 = vadd.f32 %v329_v35, %v328_v33 }
 0x187   :  { %v325_v38 = vrot.slane %v324_v36, 1 }
 0x188   :  { %v331_v39 = vrot.slane %v330_v37, 1 }
 0x189   :  { %v326_v40 = vadd.f32 %v325_v38, %v324_v36 }
 0x18a   :  { %v332_v41 = vadd.f32 %v331_v39, %v330_v37 }
 0x18b   :  { %443 = vrcp.f32 %v326_v40  ;;  %v344_v47 = vand.u32 2147483648, %v326_v40  ;;  %v342_v50 = vand.u32 2147483647, %v326_v40  ;;  %vm338_vm4 = vweird.f32 %v326_v40 }
 0x18c   :  { %445 = vrcp.f32 %v332_v41  ;;  %v359_v51 = vand.u32 2147483648, %v332_v41  ;;  %v357_v53 = vand.u32 2147483647, %v332_v41  ;;  %vm353_vm6 = vweird.f32 %v332_v41 }
 0x18d   :  { %v345_v55 = vor.u32 1.1754944e-38, %v344_v47  ;;  %vm343_vm7 = vcmp.eq.f32.partialorder %v342_v50, 8.507059e+37 }
 0x18e   :  { %v360_v58 = vor.u32 1.1754944e-38, %v359_v51  ;;  %vm358_vm9 = vcmp.eq.f32.partialorder %v357_v53, 8.507059e+37 }
 0x191   :  { %v444_v42 = vpop.eup %443 }
 0x192   :  { %v446_v43 = vpop.eup %445  ;;  %v334_v44 = vmul.f32 %v444_v42, %v326_v40  ;;  %vm339_vm2 = vweird.f32 %v444_v42 }
 0x193   :  { %v349_v45 = vmul.f32 %v446_v43, %v332_v41  ;;  %vm354_vm3 = vweird.f32 %v446_v43  ;;  %vm340_vm5 = vmor %vm338_vm4, %vm339_vm2 }
 0x194   :  { %v335_v46 = vsub.f32 1.0, %v334_v44  ;;  %vm355_vm8 = vmor %vm353_vm6, %vm354_vm3 }
 0x195   :  { %v350_v48 = vsub.f32 1.0, %v349_v45 }
 0x196   :  { %v336_v49 = vmul.f32 %v444_v42, %v335_v46 }
 0x197   :  { %v351_v52 = vmul.f32 %v446_v43, %v350_v48 }
 0x198   :  { %v337_v54 = vadd.f32 %v444_v42, %v336_v49 }
 0x199   :  { %v352_v56 = vadd.f32 %v446_v43, %v351_v52 }
 0x19a   :  { %v341_v57 = vsel %vm340_vm5, %v444_v42, %v337_v54 }
 0x19b   :  { %v346_v59 = vsel %vm343_vm7, %v345_v55, %v341_v57  ;;  %v356_v60 = vsel %vm355_vm8, %v446_v43, %v352_v56 }
 0x19c   :  { %v347_v61 = vmul.f32 %v440_v28, %v346_v59  ;;  %v361_v62 = vsel %vm358_vm9, %v360_v58, %v356_v60 }
 0x19d   :  { %v362_v63 = vmul.f32 %v442_v29, %v361_v62 }
 0x19e   :  { %v363_v0 = vmul.f32 1.442695, %v347_v61  ;;  %385 = vst [vmem:[%s663_s4] sm:$0xff] %v347_v61 }
 0x19f   :  { %v365_v1 = vmul.f32 1.442695, %v362_v63  ;;  %386 = vst [vmem:[%s663_s4 + $0x8] sm:$0xff] %v362_v63 }
 0x1a0   :  { %447 = vpow2.f32 %v363_v0 }
 0x1a1   :  { %449 = vpow2.f32 %v365_v1 }
 0x1a6   :  { %v448_v2 = vpop.eup %447 }
 0x1a7   :  { %v450_v3 = vpop.eup %449  ;;  %v367_v4 = vrot.slane %v448_v2, 4 }
 0x1a8   :  { %v373_v5 = vrot.slane %v450_v3, 4 }
 0x1a9   :  { %v368_v6 = vadd.f32 %v448_v2, %v367_v4 }
 0x1aa   :  { %v374_v7 = vadd.f32 %v450_v3, %v373_v5 }
 0x1ab   :  { %v369_v8 = vrot.slane %v368_v6, 2 }
 0x1ac   :  { %v375_v9 = vrot.slane %v374_v7, 2 }
 0x1ad   :  { %v370_v10 = vadd.f32 %v369_v8, %v368_v6 }
 0x1ae   :  { %v376_v11 = vadd.f32 %v375_v9, %v374_v7 }
 0x1af   :  { %v371_v12 = vrot.slane %v370_v10, 1 }
 0x1b0   :  { %v377_v13 = vrot.slane %v376_v11, 1 }
 0x1b1   :  { %v372_v14 = vadd.f32 %v371_v12, %v370_v10 }
 0x1b2   :  { %v378_v15 = vadd.f32 %v377_v13, %v376_v11 }
 0x1b3   :  { %451 = vlog2.f32 %v372_v14 }
 0x1b4   :  { %453 = vlog2.f32 %v378_v15 }
 0x1b9   :  { %v452_v16 = vpop.eup %451 }
 0x1ba   :  { %v454_v17 = vpop.eup %453  ;;  %v380_v18 = vmul.f32 0.6931472, %v452_v16 }
 0x1bb   :  { %v382_v19 = vmul.f32 0.6931472, %v454_v17 }
 0x1bc   :  { %v383_v20 = vsub.f32 %v347_v61, %v380_v18 }
 0x1bd   :  { %v384_v21 = vsub.f32 %v362_v63, %v382_v19 }
 0x1be   :  { %387 = vst [vmem:[%s663_s4 + $0x10] sm:$0xff] %v383_v20 }
 0x1bf   :  { %388 = vst [vmem:[%s663_s4 + $0x18] sm:$0xff] %v384_v21 }

</bundles_post_ra>
